<compile_context>
chip_gen: v5e
topology: v5e:2x2
jax: 0.10.0
libtpu: 0.0.40
codegen_flags: <defaults>
</compile_context>

<pallas_src>
import jax
import jax.numpy as jnp
from jax import lax
from jax.experimental import pallas as pl
from jax.experimental.pallas import tpu as pltpu

_EPS = 1e-5


def _round_up(x, m):
    return (x + m - 1) // m * m


def _pad_axis(a, target, axis, value=0.0):
    pad = target - a.shape[axis]
    if pad <= 0:
        return a
    widths = [(0, 0)] * a.ndim
    widths[axis] = (0, pad)
    return jnp.pad(a, widths, constant_values=value)


def _bn_relu(h, gamma, beta):
    # Training-mode BatchNorm1d (batch mean, biased batch variance), fused affine, f32.
    mu = jnp.mean(h, axis=0, keepdims=True)
    var = jnp.maximum(jnp.mean(h * h, axis=0, keepdims=True) - mu * mu, 0.0)
    s = gamma * lax.rsqrt(var + _EPS)          # rsqrt -> EUP slot (free-ish)
    t = beta - mu * s
    return jnp.maximum(h * s + t, 0.0)


def child_model_kernel(x_ref, w1_ref, w2_ref, w3_ref, vec_ref, o_ref):
    # x_ref:   [B, F]  bf16
    # w1_ref:  [F, P]  bf16      w2_ref / w3_ref: [P, P] bf16 (zero-padded)
    # vec_ref: [8, P]  f32  rows: 0=g1 1=be1 2=g2 3=be2 4=b3 (zero-padded)
    g1, be1 = vec_ref[0:1, :], vec_ref[1:2, :]
    g2, be2 = vec_ref[2:3, :], vec_ref[3:4, :]
    b3 = vec_ref[4:5, :]

    # fc_in (+ norm_in + relu); Linear bias omitted: cancelled by BN mean subtraction.
    h1 = jnp.dot(x_ref[...], w1_ref[...], preferred_element_type=jnp.float32)
    h1 = _bn_relu(h1, g1, be1)

    # fc_middle (+ norm_middle + relu); bias omitted (BN-cancelled).
    h2 = jnp.dot(h1.astype(jnp.bfloat16), w2_ref[...],
                 preferred_element_type=jnp.float32)
    h2 = _bn_relu(h2, g2, be2)

    # fc_out (real bias kept).
    out = jnp.dot(h2.astype(jnp.bfloat16), w3_ref[...],
                  preferred_element_type=jnp.float32)
    o_ref[...] = (out + b3).astype(o_ref.dtype)


def child_model_forward(x, params):
    """x: [B, H, W] (or [B, F]); params as in init_params. Returns [B, num_classes] f32."""
    B = x.shape[0]
    x2d = x.reshape(B, -1)

    w1, w2, w3 = params["w1"], params["w2"], params["w3"]
    g1, be1 = params["g1"], params["be1"]
    g2, be2 = params["g2"], params["be2"]
    b3 = params["b3"]

    H1, H2, C = w1.shape[1], w2.shape[1], w3.shape[1]
    P = _round_up(max(H1, H2, C), 128)   # common lane-dense feature width

    # bf16 MXU operands, zero-padded so every feature dim equals P (multiple of 128).
    x_b = x2d.astype(jnp.bfloat16)
    w1_p = _pad_axis(w1, P, 1).astype(jnp.bfloat16)                    # [F, P]
    w2_p = _pad_axis(_pad_axis(w2, P, 0), P, 1).astype(jnp.bfloat16)   # [P, P]
    w3_p = _pad_axis(_pad_axis(w3, P, 0), P, 1).astype(jnp.bfloat16)   # [P, P]

    # Pack every per-feature vector into one (8, P) f32 tile (single operand / DMA).
    vec = jnp.zeros((8, P), jnp.float32)
    vec = vec.at[0, :H1].set(g1).at[0, H1:].set(1.0)
    vec = vec.at[1, :H1].set(be1)
    vec = vec.at[2, :H2].set(g2).at[2, H2:].set(1.0)
    vec = vec.at[3, :H2].set(be2)
    vec = vec.at[4, :C].set(b3)

    vmem = pl.BlockSpec(memory_space=pltpu.MemorySpace.VMEM)
    out_p = pl.pallas_call(
        child_model_kernel,
        out_shape=jax.ShapeDtypeStruct((B, P), jnp.float32),
        in_specs=[vmem] * 5,
        out_specs=vmem,
    )(x_b, w1_p, w2_p, w3_p, vec)
    return out_p[:, :C]


def init_params(key, input_square, num_classes):
    h1 = input_square // 2
    h2 = input_square // 4
    ks = jax.random.split(key, 6)
    s1, s2, s3 = 1.0 / input_square ** 0.5, 1.0 / h1 ** 0.5, 1.0 / h2 ** 0.5
    return {
        # Linear weights stored [in, out] (transposed vs. PyTorch's [out, in]).
        "w1": jax.random.uniform(ks[0], (input_square, h1), jnp.float32, -s1, s1),
        "b1": jax.random.uniform(ks[1], (h1,), jnp.float32, -s1, s1),
        "g1": jnp.ones((h1,), jnp.float32),
        "be1": jnp.zeros((h1,), jnp.float32),
        "w2": jax.random.uniform(ks[2], (h1, h2), jnp.float32, -s2, s2),
        "b2": jax.random.uniform(ks[3], (h2,), jnp.float32, -s2, s2),
        "g2": jnp.ones((h2,), jnp.float32),
        "be2": jnp.zeros((h2,), jnp.float32),
        "w3": jax.random.uniform(ks[4], (h2, num_classes), jnp.float32, -s3, s3),
        "b3": jax.random.uniform(ks[5], (num_classes,), jnp.float32, -s3, s3),
    }


def reference_forward(x, params, eps=1e-5):
    """Faithful ChildModel forward (training-mode BN, includes the fc_in/fc_middle
    biases that BN cancels), with matmul operands rounded to bf16 to mirror the
    kernel's MXU precision."""
    bf = lambda a: a.astype(jnp.bfloat16).astype(jnp.float32)
    B = x.shape[0]
    h = x.reshape(B, -1).astype(jnp.float32)

    h = bf(h) @ bf(params["w1"]) + params["b1"]
    mu = jnp.mean(h, 0)
    var = jnp.mean((h - mu) ** 2, 0)
    h = jnp.maximum((h - mu) / jnp.sqrt(var + eps) * params["g1"] + params["be1"], 0.0)

    h = bf(h) @ bf(params["w2"]) + params["b2"]
    mu = jnp.mean(h, 0)
    var = jnp.mean((h - mu) ** 2, 0)
    h = jnp.maximum((h - mu) / jnp.sqrt(var + eps) * params["g2"] + params["be2"], 0.0)

    return bf(h) @ bf(params["w3"]) + params["b3"]


if __name__ == "__main__":
    # Module config: input_shape=(16, 16) -> input_square=256, hidden 128/64, 10 classes.
    H, W = 16, 16
    num_classes = 10
    batch = 8

    key = jax.random.PRNGKey(0)
    kx, kp = jax.random.split(key)
    x = jax.random.normal(kx, (batch, H, W), dtype=jnp.float32)
    params = init_params(kp, H * W, num_classes)

    out = child_model_forward(x, params)
    out = jax.block_until_ready(out)

    ref = reference_forward(x, params)
    assert out.shape == (batch, num_classes)
    assert jnp.allclose(out, ref, atol=1e-2, rtol=1e-2), "mismatch vs reference"

    print("KERNEL_OK")
</pallas_src>

<mosaic_0001>
module attributes {stable_mosaic.version = 11 : i64} {
  func.func @child_model_kernel(%arg0: memref<8x256xbf16, #tpu.memory_space<vmem>>, %arg1: memref<256x128xbf16, #tpu.memory_space<vmem>>, %arg2: memref<128x128xbf16, #tpu.memory_space<vmem>>, %arg3: memref<128x128xbf16, #tpu.memory_space<vmem>>, %arg4: memref<8x128xf32, #tpu.memory_space<vmem>>, %arg5: memref<8x128xf32, #tpu.memory_space<vmem>>) attributes {dimension_semantics = [], scalar_prefetch = 0 : i64, scratch_operands = 0 : i64, tpu.core_type = #tpu.core_type<tc>} {
    %c0 = arith.constant 0 : index
    %c0_0 = arith.constant 0 : index
    %0 = vector.load %arg4[%c0, %c0_0] : memref<8x128xf32, #tpu.memory_space<vmem>>, vector<1x128xf32>
    %c1 = arith.constant 1 : index
    %c0_1 = arith.constant 0 : index
    %1 = vector.load %arg4[%c1, %c0_1] : memref<8x128xf32, #tpu.memory_space<vmem>>, vector<1x128xf32>
    %c2 = arith.constant 2 : index
    %c0_2 = arith.constant 0 : index
    %2 = vector.load %arg4[%c2, %c0_2] : memref<8x128xf32, #tpu.memory_space<vmem>>, vector<1x128xf32>
    %c3 = arith.constant 3 : index
    %c0_3 = arith.constant 0 : index
    %3 = vector.load %arg4[%c3, %c0_3] : memref<8x128xf32, #tpu.memory_space<vmem>>, vector<1x128xf32>
    %c4 = arith.constant 4 : index
    %c0_4 = arith.constant 0 : index
    %4 = vector.load %arg4[%c4, %c0_4] : memref<8x128xf32, #tpu.memory_space<vmem>>, vector<1x128xf32>
    %c0_5 = arith.constant 0 : index
    %c0_6 = arith.constant 0 : index
    %5 = vector.load %arg0[%c0_5, %c0_6] : memref<8x256xbf16, #tpu.memory_space<vmem>>, vector<8x256xbf16>
    %c0_7 = arith.constant 0 : index
    %c0_8 = arith.constant 0 : index
    %6 = vector.load %arg1[%c0_7, %c0_8] : memref<256x128xbf16, #tpu.memory_space<vmem>>, vector<256x128xbf16>
    %cst = arith.constant dense<0.000000e+00> : vector<8x128xf32>
    %7 = tpu.matmul %5, %6, %cst {dimension_numbers = #tpu.dot_dimension_numbers<[1], [0], [0], [1], [0, 0, 1, 1], [], []>} : vector<8x256xbf16>, vector<256x128xbf16>, vector<8x128xf32> -> vector<8x128xf32>
    %cst_9 = arith.constant dense<0.000000e+00> : vector<128xf32>
    %8 = vector.multi_reduction <add>, %7, %cst_9 [0] : vector<8x128xf32> to vector<128xf32>
    %9 = vector.shape_cast %8 : vector<128xf32> to vector<1x128xf32>
    %cst_10 = arith.constant 8.000000e+00 : f32
    %10 = vector.broadcast %cst_10 : f32 to vector<1x128xf32>
    %11 = arith.divf %9, %10 : vector<1x128xf32>
    %12 = arith.mulf %7, %7 : vector<8x128xf32>
    %cst_11 = arith.constant dense<0.000000e+00> : vector<128xf32>
    %13 = vector.multi_reduction <add>, %12, %cst_11 [0] : vector<8x128xf32> to vector<128xf32>
    %14 = vector.shape_cast %13 : vector<128xf32> to vector<1x128xf32>
    %cst_12 = arith.constant 8.000000e+00 : f32
    %15 = vector.broadcast %cst_12 : f32 to vector<1x128xf32>
    %16 = arith.divf %14, %15 : vector<1x128xf32>
    %17 = arith.mulf %11, %11 : vector<1x128xf32>
    %18 = arith.subf %16, %17 : vector<1x128xf32>
    %cst_13 = arith.constant 0.000000e+00 : f32
    %19 = vector.broadcast %cst_13 : f32 to vector<1x128xf32>
    %20 = arith.maximumf %18, %19 : vector<1x128xf32>
    %cst_14 = arith.constant 9.99999974E-6 : f32
    %21 = vector.broadcast %cst_14 : f32 to vector<1x128xf32>
    %22 = arith.addf %20, %21 : vector<1x128xf32>
    %23 = math.rsqrt %22 : vector<1x128xf32>
    %24 = arith.mulf %0, %23 : vector<1x128xf32>
    %25 = arith.mulf %11, %24 : vector<1x128xf32>
    %26 = arith.subf %1, %25 : vector<1x128xf32>
    %27 = vector.broadcast %24 : vector<1x128xf32> to vector<8x128xf32>
    %28 = arith.mulf %7, %27 : vector<8x128xf32>
    %29 = vector.broadcast %26 : vector<1x128xf32> to vector<8x128xf32>
    %30 = arith.addf %28, %29 : vector<8x128xf32>
    %cst_15 = arith.constant 0.000000e+00 : f32
    %31 = vector.broadcast %cst_15 : f32 to vector<8x128xf32>
    %32 = arith.maximumf %30, %31 : vector<8x128xf32>
    %33 = arith.truncf %32 : vector<8x128xf32> to vector<8x128xbf16>
    %c0_16 = arith.constant 0 : index
    %c0_17 = arith.constant 0 : index
    %34 = vector.load %arg2[%c0_16, %c0_17] : memref<128x128xbf16, #tpu.memory_space<vmem>>, vector<128x128xbf16>
    %cst_18 = arith.constant dense<0.000000e+00> : vector<8x128xf32>
    %35 = tpu.matmul %33, %34, %cst_18 {dimension_numbers = #tpu.dot_dimension_numbers<[1], [0], [0], [1], [0, 0, 1, 1], [], []>} : vector<8x128xbf16>, vector<128x128xbf16>, vector<8x128xf32> -> vector<8x128xf32>
    %cst_19 = arith.constant dense<0.000000e+00> : vector<128xf32>
    %36 = vector.multi_reduction <add>, %35, %cst_19 [0] : vector<8x128xf32> to vector<128xf32>
    %37 = vector.shape_cast %36 : vector<128xf32> to vector<1x128xf32>
    %cst_20 = arith.constant 8.000000e+00 : f32
    %38 = vector.broadcast %cst_20 : f32 to vector<1x128xf32>
    %39 = arith.divf %37, %38 : vector<1x128xf32>
    %40 = arith.mulf %35, %35 : vector<8x128xf32>
    %cst_21 = arith.constant dense<0.000000e+00> : vector<128xf32>
    %41 = vector.multi_reduction <add>, %40, %cst_21 [0] : vector<8x128xf32> to vector<128xf32>
    %42 = vector.shape_cast %41 : vector<128xf32> to vector<1x128xf32>
    %cst_22 = arith.constant 8.000000e+00 : f32
    %43 = vector.broadcast %cst_22 : f32 to vector<1x128xf32>
    %44 = arith.divf %42, %43 : vector<1x128xf32>
    %45 = arith.mulf %39, %39 : vector<1x128xf32>
    %46 = arith.subf %44, %45 : vector<1x128xf32>
    %cst_23 = arith.constant 0.000000e+00 : f32
    %47 = vector.broadcast %cst_23 : f32 to vector<1x128xf32>
    %48 = arith.maximumf %46, %47 : vector<1x128xf32>
    %cst_24 = arith.constant 9.99999974E-6 : f32
    %49 = vector.broadcast %cst_24 : f32 to vector<1x128xf32>
    %50 = arith.addf %48, %49 : vector<1x128xf32>
    %51 = math.rsqrt %50 : vector<1x128xf32>
    %52 = arith.mulf %2, %51 : vector<1x128xf32>
    %53 = arith.mulf %39, %52 : vector<1x128xf32>
    %54 = arith.subf %3, %53 : vector<1x128xf32>
    %55 = vector.broadcast %52 : vector<1x128xf32> to vector<8x128xf32>
    %56 = arith.mulf %35, %55 : vector<8x128xf32>
    %57 = vector.broadcast %54 : vector<1x128xf32> to vector<8x128xf32>
    %58 = arith.addf %56, %57 : vector<8x128xf32>
    %cst_25 = arith.constant 0.000000e+00 : f32
    %59 = vector.broadcast %cst_25 : f32 to vector<8x128xf32>
    %60 = arith.maximumf %58, %59 : vector<8x128xf32>
    %61 = arith.truncf %60 : vector<8x128xf32> to vector<8x128xbf16>
    %c0_26 = arith.constant 0 : index
    %c0_27 = arith.constant 0 : index
    %62 = vector.load %arg3[%c0_26, %c0_27] : memref<128x128xbf16, #tpu.memory_space<vmem>>, vector<128x128xbf16>
    %cst_28 = arith.constant dense<0.000000e+00> : vector<8x128xf32>
    %63 = tpu.matmul %61, %62, %cst_28 {dimension_numbers = #tpu.dot_dimension_numbers<[1], [0], [0], [1], [0, 0, 1, 1], [], []>} : vector<8x128xbf16>, vector<128x128xbf16>, vector<8x128xf32> -> vector<8x128xf32>
    %64 = vector.broadcast %4 : vector<1x128xf32> to vector<8x128xf32>
    %65 = arith.addf %63, %64 : vector<8x128xf32>
    %c0_29 = arith.constant 0 : index
    %c0_30 = arith.constant 0 : index
    %66 = vector.load %arg5[%c0_29, %c0_30] : memref<8x128xf32, #tpu.memory_space<vmem>>, vector<8x128xf32>
    tpu.vector_store %arg5[%c0_29, %c0_30], %65 {strides = array<i32>} : memref<8x128xf32, #tpu.memory_space<vmem>>, vector<8x128xf32>,
    return
  }
}

</mosaic_0001>

<bundles_post_ra>
// kernel: tpu_custom_call.1
= control target key start
LH: loop header
LB: loop body
LE: loop exit
PB: predicated region body
PF: predicated region fallthrough
CT: control target
= control target key end

     0   :  { %10 = vsyncpa [#allocation3], 0  ;;  %s911_s0 = inlined_call_operand.hbm [shape: bf16[8,256], index: 0, kind: input, shape index: {}]   ;;  %s912_s1 = inlined_call_operand.hbm [shape: bf16[256,128], index: 1, kind: input, shape index: {}]   ;;  %s913_s2 = inlined_call_operand.hbm [shape: bf16[128,128], index: 2, kind: input, shape index: {}]   ;;  %s914_s3 = inlined_call_operand.hbm [shape: bf16[128,128], index: 3, kind: input, shape index: {}]   ;;  %s915_s4 = inlined_call_operand.hbm [shape: f32[8,128], index: 4, kind: input, shape index: {}]   ;;  %s916_s5 = inlined_call_operand.hbm [shape: f32[8,128], index: 5, kind: output, shape index: {}]  }
   0x1   :  { %11 = vsyncpa [#allocation6], 0 }
   0x2   :  { %12 = vsyncpa [#allocation9], 0  ;;  %s29_s20 = sshll.u32 %s912_s1, 4  ;;  %s30_s20 = int_to_ptr.hbm [resolvable:$true] %s29_s20 }
   0x3   :  { %13 = vsyncpa [#allocation4], 0  ;;  %s848_s21 = smov [#allocation5]   ;;  %s55_s25 = sshll.u32 %s914_s3, 4  ;;  %s56_s25 = int_to_ptr.hbm [resolvable:$true] %s55_s25 }
   0x4   :  { %s31_s22 = sshll.u32 %s848_s21, 4  ;;  %s849_s26 = smov 64   ;;  %s32_s22 = int_to_ptr.vmem [resolvable:$true] %s31_s22 }
   0x5   :  { %s850_s27 = smov 4   ;;  %s851_s28 = smov [#allocation8]  }
   0x6   :  { %37 = dma.hbm_to_vmem [thread:$0]  %s30_s20, 2048, %s32_s22, [#allocation6], %s849_s26, %s849_s26, %s850_s27  }
   0x7   :  { %s57_s29 = sshll.u32 %s851_s28, 4  ;;  %s19_s7 = sshll.u32 %s911_s0, 4  ;;  %s58_s29 = int_to_ptr.vmem [resolvable:$true] %s57_s29  ;;  %s20_s7 = int_to_ptr.hbm [resolvable:$true] %s19_s7 }
   0x8   :  { %63 = dma.hbm_to_vmem [thread:$0]  %s56_s25, 1024, %s58_s29, [#allocation9], %s849_s26, %s849_s26, %s850_s27  }
   0x9   :  { %s42_s9 = sshll.u32 %s913_s2, 4  ;;  %s852_s10 = smov [#allocation2]   ;;  %s43_s9 = int_to_ptr.hbm [resolvable:$true] %s42_s9 }
   0xa   :  { %s21_s11 = sshll.u32 %s852_s10, 4  ;;  %s853_s3 = smov [#allocation7]   ;;  %s22_s11 = int_to_ptr.vmem [resolvable:$true] %s21_s11 }
   0xb   :  { %24 = dma.hbm_to_vmem [thread:$0]  %s20_s7, 128, %s22_s11, [#allocation3]  }
   0xc   :  { %s44_s12 = sshll.u32 %s853_s3, 4  ;;  %s69_s15 = sshll.u32 %s915_s4, 4  ;;  %s45_s12 = int_to_ptr.vmem [resolvable:$true] %s44_s12  ;;  %s70_s15 = int_to_ptr.hbm [resolvable:$true] %s69_s15 }
   0xd   :  { %50 = dma.hbm_to_vmem [thread:$0]  %s43_s9, 1024, %s45_s12, [#allocation6], %s849_s26, %s849_s26, %s850_s27  }
   0xe   :  { %s854_s0 = smov [#allocation10]  }
   0xf   :  { %s71_s16 = sshll.u32 %s854_s0, 4  ;;  %s72_s16 = int_to_ptr.vmem [resolvable:$true] %s71_s16 }
  0x10   :  { %74 = dma.hbm_to_vmem [thread:$0]  %s70_s15, 128, %s72_s16, [#allocation9]  }
  0x11   :  { %840 = dma.done.wait [#allocation3], 128  }
  0x12   :  { %841 = vsyncadd [#allocation3], 4294967168 }
  0x13   :  { %842 = dma.done.wait [#allocation6], 3072  }
  0x14   :  { %843 = vsyncadd [#allocation6], 4294964224 }
  0x15   :  { %844 = dma.done.wait [#allocation9], 1152  }
  0x16   :  { %845 = vsyncadd [#allocation9], 4294966144  ;;  %v655_v0 = vld [vmem:[#allocation5 + $0x38] sm:$0xff]  ;;  %v654_v2 = vld [vmem:[#allocation5 + $0x30] sm:$0xff]  ;;  %v855_v23 = vmov 8.0   ;;  %s856_s2 = smov [#allocation11]  }
  0x17   :  { %v663_v1 = vld [vmem:[#allocation5 + $0x78] sm:$0xff]  ;;  %236 = vmatpush.bf16.msra.mxu0 %v655_v0  ;;  %v662_v3 = vld [vmem:[#allocation5 + $0x70] sm:$0xff]  ;;  %v653_v4 = vld [vmem:[#allocation5 + $0x28] sm:$0xff]  ;;  %690 = vrcp.f32 %v855_v23  ;;  %s506_s4 = sshll.u32 %s856_s2, 4  ;;  %s508_s19 = sshll.u32 %s916_s5, 4  ;;  %s507_s4 = int_to_ptr.vmem [resolvable:$true] %s506_s4  ;;  %s509_s19 = int_to_ptr.hbm [resolvable:$true] %s508_s19 }
  0x18   :  { %249 = vmatpush.bf16.msra.mxu1 %v663_v1  ;;  %v661_v5 = vld [vmem:[#allocation5 + $0x68] sm:$0xff]  ;;  %v652_v6 = vld [vmem:[#allocation5 + $0x20] sm:$0xff]  ;;  %v651_v8 = vld [vmem:[#allocation5 + $0x18] sm:$0xff] }
  0x19   :  { %v660_v7 = vld [vmem:[#allocation5 + $0x60] sm:$0xff]  ;;  %v659_v9 = vld [vmem:[#allocation5 + $0x58] sm:$0xff]  ;;  %v650_v10 = vld [vmem:[#allocation5 + $0x10] sm:$0xff] }
  0x1a   :  { %v658_v11 = vld [vmem:[#allocation5 + $0x50] sm:$0xff]  ;;  %v649_v12 = vld [vmem:[#allocation5 + $0x8] sm:$0xff]  ;;  %v100_v14 = vld [vmem:[#allocation2] sm:$0xff] }
  0x1b   :  { %237 = vmatpush.bf16.msra.mxu0 %v654_v2  ;;  %v657_v13 = vld [vmem:[#allocation5 + $0x48] sm:$0xff]  ;;  %v134_v15 = vunpack.c.l.b16 %v100_v14  ;;  %v135_v16 = vunpack.c.h.b16 %v100_v14  ;;  %v648_v17 = vld [vmem:[#allocation5] sm:$0xff]  ;;  %v671_v21 = vld [vmem:[#allocation7 + $0x38] sm:$0xff] }
  0x1c   :  { %250 = vmatpush.bf16.msra.mxu1 %v662_v3  ;;  %v656_v18 = vld [vmem:[#allocation5 + $0x40] sm:$0xff]  ;;  %371 = vmatpush.bf16.msra.mxu2 %v671_v21  ;;  %v670_v22 = vld [vmem:[#allocation7 + $0x30] sm:$0xff]  ;;  %v669_v24 = vld [vmem:[#allocation7 + $0x28] sm:$0xff] }
  0x1d   :  { %v136_v19 = vpack.c.b16 %v134_v15, %v134_v15  ;;  %v137_v20 = vpack.c.b16 %v135_v16, %v135_v16  ;;  %v691_v25 = vpop.eup %690  ;;  %v668_v26 = vld [vmem:[#allocation7 + $0x20] sm:$0xff]  ;;  %v667_v28 = vld [vmem:[#allocation7 + $0x18] sm:$0xff]  ;;  %v666_v33 = vld [vmem:[#allocation7 + $0x10] sm:$0xff] }
  0x1e   :  { %v269_v27 = vmul.f32 8.0, %v691_v25  ;;  %v665_v39 = vld [vmem:[#allocation7 + $0x8] sm:$0xff]  ;;  %v664_v47 = vld [vmem:[#allocation7] sm:$0xff]  ;;  %vm273_vm0 = vweird.f32 %v691_v25  ;;  %v679_v14 = vld [vmem:[#allocation8 + $0x38] sm:$0xff] }
  0x1f   :  { %238 = vmatpush.bf16.msra.mxu0 %v653_v4  ;;  %v95_v1 = vld [vmem:[#allocation10] sm:$0x1]  ;;  %487 = vmatpush.bf16.msra.mxu3 %v679_v14  ;;  %v678_v15 = vld [vmem:[#allocation8 + $0x30] sm:$0xff]  ;;  %v677_v16 = vld [vmem:[#allocation8 + $0x28] sm:$0xff] }
  0x20   :  { %251 = vmatpush.bf16.msra.mxu1 %v661_v5  ;;  %372 = vmatpush.bf16.msra.mxu2 %v670_v22  ;;  %v270_v31 = vsub.f32 1.0, %v269_v27  ;;  %v96_v5 = vld [vmem:[#allocation10 + $0x1] sm:$0x1]  ;;  %v674_v22 = vld [vmem:[#allocation8 + $0x10] sm:$0xff]  ;;  %v673_v27 = vld [vmem:[#allocation8 + $0x8] sm:$0xff] }
  0x22   :  { %v271_v36 = vmul.f32 %v691_v25, %v270_v31 }
  0x23   :  { %239 = vmatpush.bf16.msra.mxu0 %v652_v6  ;;  %488 = vmatpush.bf16.msra.mxu3 %v678_v15 }
  0x24   :  { %252 = vmatpush.bf16.msra.mxu1 %v660_v7  ;;  %373 = vmatpush.bf16.msra.mxu2 %v669_v24  ;;  %v272_v44 = vadd.f32 %v691_v25, %v271_v36 }
  0x26   :  { %v902_v50 = vsel %vm273_vm0, %v691_v25, %v272_v44 }
  0x27   :  { %240 = vmatpush.bf16.msra.mxu0 %v651_v8  ;;  %489 = vmatpush.bf16.msra.mxu3 %v677_v16 }
  0x28   :  { %253 = vmatpush.bf16.msra.mxu1 %v659_v9  ;;  %374 = vmatpush.bf16.msra.mxu2 %v668_v26 }
  0x2b   :  { %241 = vmatpush.bf16.msra.mxu0 %v650_v10 }
  0x2c   :  { %254 = vmatpush.bf16.msra.mxu1 %v658_v11  ;;  %375 = vmatpush.bf16.msra.mxu2 %v667_v28 }
  0x2f   :  { %242 = vmatpush.bf16.msra.mxu0 %v649_v12 }
  0x30   :  { %255 = vmatpush.bf16.msra.mxu1 %v657_v13  ;;  %376 = vmatpush.bf16.msra.mxu2 %v666_v33  ;;  %v672_v33 = vld [vmem:[#allocation8] sm:$0xff] }
  0x33   :  { %243 = vmatpush.bf16.msra.mxu0 %v648_v17  ;;  %v676_v17 = vld [vmem:[#allocation8 + $0x20] sm:$0xff] }
  0x34   :  { %256 = vmatpush.bf16.msra.mxu1 %v656_v18  ;;  %377 = vmatpush.bf16.msra.mxu2 %v665_v39  ;;  %v675_v18 = vld [vmem:[#allocation8 + $0x18] sm:$0xff] }
  0x35   :  { %490 = vmatpush.bf16.msra.mxu3 %v676_v17 }
  0x36   :  { %244 = vmatmul.bf16.vlgmr.msra.gmra.mxu0 %v136_v19 }
  0x37   :  { %257 = vmatmul.bf16.vlgmr.msra.gmra.mxu1 %v137_v20 }
  0x38   :  { %378 = vmatpush.bf16.msra.mxu2 %v664_v47 }
  0x39   :  { %491 = vmatpush.bf16.msra.mxu3 %v675_v18 }
  0x3d   :  { %492 = vmatpush.bf16.msra.mxu3 %v674_v22 }
  0x41   :  { %493 = vmatpush.bf16.msra.mxu3 %v673_v27 }
  0x45   :  { %494 = vmatpush.bf16.msra.mxu3 %v672_v33 }
  0xb3   :  { %v245_v29 = vpop.f32.mrf.mxu0 }
  0xb4   :  { %v258_v30 = vpop.f32.mrf.mxu1 }
  0xb5   :  { %v259_v32 = vadd.f32 %v258_v30, %v245_v29 }
  0xb7   :  { %v262_v34 = vrot.slane %v259_v32, 4  ;;  %v276_v35 = vmul.f32 %v259_v32, %v259_v32 }
  0xb9   :  { %v263_v37 = vadd.f32 %v262_v34, %v259_v32  ;;  %v277_v38 = vrot.slane %v276_v35, 4 }
  0xbb   :  { %v264_v40 = vrot.slane %v263_v37, 2  ;;  %v278_v41 = vadd.f32 %v277_v38, %v276_v35  ;;  %v247_v42 = vpop.f32.mrf.mxu0 }
  0xbc   :  { %v260_v43 = vpop.f32.mrf.mxu1 }
  0xbd   :  { %v265_v45 = vadd.f32 %v264_v40, %v263_v37  ;;  %v279_v46 = vrot.slane %v278_v41, 2 }
  0xbf   :  { %v266_v48 = vrot.slane %v265_v45, 1  ;;  %v280_v49 = vadd.f32 %v279_v46, %v278_v41 }
  0xc1   :  { %v281_v51 = vrot.slane %v280_v49, 1  ;;  %v267_v52 = vadd.f32 %v266_v48, %v265_v45  ;;  %v97_v48 = vld [vmem:[#allocation10 + $0x2] sm:$0x1] }
  0xc3   :  { %v282_v53 = vadd.f32 %v281_v51, %v280_v49  ;;  %v275_v54 = vmul.f32 %v902_v50, %v267_v52 }
  0xc5   :  { %v283_v55 = vmul.f32 %v282_v53, %v902_v50  ;;  %v284_v56 = vmul.f32 %v275_v54, %v275_v54  ;;  %v98_v53 = vld [vmem:[#allocation10 + $0x3] sm:$0x1] }
  0xc7   :  { %v285_v57 = vsub.f32 %v283_v55, %v284_v56 }
  0xc9   :  { %v286_v58 = vmax.f32 %v285_v57, 0.0 }
  0xcb   :  { %v287_v59 = vadd.f32 1e-05, %v286_v58 }
  0xcd   :  { %692 = vrsqrt.f32 %v287_v59  ;;  %vm294_vm2 = vweird.f32 %v287_v59 }
  0xd3   :  { %v693_v60 = vpop.eup %692 }
  0xd4   :  { %v289_v61 = vmul.f32 %v693_v60, %v287_v59  ;;  %vm295_vm1 = vweird.f32 %v693_v60 }
  0xd5   :  { %vm296_vm3 = vmor %vm294_vm2, %vm295_vm1 }
  0xd6   :  { %v290_v62 = vmul.f32 %v693_v60, %v289_v61  ;;  %v689_v61 = vld [vmem:[#allocation10 + $0x4] ss:$0 sm:$0xff] }
  0xd8   :  { %v291_v63 = vmul.f32 0.5, %v290_v62 }
  0xda   :  { %v292_v0 = vsub.f32 1.5, %v291_v63 }
  0xdc   :  { %v293_v2 = vmul.f32 %v693_v60, %v292_v0 }
  0xde   :  { %v297_v3 = vsel %vm296_vm3, %v693_v60, %v293_v2 }
  0xdf   :  { %v298_v4 = vmul.f32 %v297_v3, %v95_v1 }
  0xe1   :  { %v299_v6 = vmul.f32 %v298_v4, %v275_v54  ;;  %v301_v7 = vperm.slane %v298_v4, 0 }
  0xe3   :  { %v300_v8 = vsub.f32 %v96_v5, %v299_v6  ;;  %v302_v9 = vmul.f32 %v301_v7, %v259_v32 }
  0xe5   :  { %v303_v10 = vperm.slane %v300_v8, 0 }
  0xe7   :  { %v304_v11 = vadd.f32 %v303_v10, %v302_v9 }
  0xe9   :  { %v305_v12 = vmax.f32 %v304_v11, 0.0 }
  0xeb   :  { %v306_v13 = vpack.c.bf16 %v305_v12, %v305_v12 }
  0xed   :  { %379 = vmatmul.bf16.vlgmr.msra.gmra.mxu2 %v306_v13 }
 0x170   :  { %v380_v19 = vpop.f32.mrf.mxu2 }
 0x171   :  { %v384_v20 = vrot.slane %v380_v19, 4  ;;  %v391_v21 = vmul.f32 %v380_v19, %v380_v19 }
 0x173   :  { %v385_v23 = vadd.f32 %v384_v20, %v380_v19  ;;  %v392_v24 = vrot.slane %v391_v21, 4 }
 0x175   :  { %v386_v25 = vrot.slane %v385_v23, 2  ;;  %v393_v26 = vadd.f32 %v392_v24, %v391_v21 }
 0x177   :  { %v387_v28 = vadd.f32 %v386_v25, %v385_v23  ;;  %v394_v29 = vrot.slane %v393_v26, 2 }
 0x178   :  { %v382_v30 = vpop.f32.mrf.mxu2 }
 0x179   :  { %v388_v31 = vrot.slane %v387_v28, 1  ;;  %v395_v32 = vadd.f32 %v394_v29, %v393_v26 }
 0x17b   :  { %v389_v34 = vadd.f32 %v388_v31, %v387_v28  ;;  %v396_v35 = vrot.slane %v395_v32, 1 }
 0x17d   :  { %v397_v36 = vadd.f32 %v396_v35, %v395_v32  ;;  %v390_v37 = vmul.f32 %v389_v34, %v902_v50 }
 0x17f   :  { %v398_v38 = vmul.f32 %v397_v36, %v902_v50  ;;  %v399_v39 = vmul.f32 %v390_v37, %v390_v37 }
 0x181   :  { %v400_v40 = vsub.f32 %v398_v38, %v399_v39 }
 0x183   :  { %v401_v41 = vmax.f32 %v400_v40, 0.0 }
 0x185   :  { %v402_v42 = vadd.f32 1e-05, %v401_v41 }
 0x187   :  { %694 = vrsqrt.f32 %v402_v42  ;;  %vm409_vm5 = vweird.f32 %v402_v42 }
 0x18d   :  { %v695_v43 = vpop.eup %694 }
 0x18e   :  { %v404_v44 = vmul.f32 %v695_v43, %v402_v42  ;;  %vm410_vm4 = vweird.f32 %v695_v43 }
 0x18f   :  { %vm411_vm6 = vmor %vm409_vm5, %vm410_vm4 }
 0x190   :  { %v405_v45 = vmul.f32 %v695_v43, %v404_v44 }
 0x192   :  { %v406_v46 = vmul.f32 0.5, %v405_v45 }
 0x194   :  { %v407_v47 = vsub.f32 1.5, %v406_v46 }
 0x196   :  { %v408_v49 = vmul.f32 %v695_v43, %v407_v47 }
 0x198   :  { %v412_v51 = vsel %vm411_vm6, %v695_v43, %v408_v49 }
 0x199   :  { %v413_v52 = vmul.f32 %v412_v51, %v97_v48 }
 0x19b   :  { %v414_v54 = vmul.f32 %v413_v52, %v390_v37  ;;  %v416_v50 = vperm.slane %v413_v52, 0 }
 0x19d   :  { %v415_v55 = vsub.f32 %v98_v53, %v414_v54  ;;  %v417_v56 = vmul.f32 %v416_v50, %v380_v19 }
 0x19f   :  { %v418_v57 = vperm.slane %v415_v55, 0 }
 0x1a1   :  { %v419_v58 = vadd.f32 %v418_v57, %v417_v56 }
 0x1a3   :  { %v420_v59 = vmax.f32 %v419_v58, 0.0 }
 0x1a5   :  { %v421_v60 = vpack.c.bf16 %v420_v59, %v420_v59 }
 0x1a7   :  { %495 = vmatmul.bf16.vlgmr.msra.gmra.mxu3 %v421_v60 }
 0x22a   :  { %v496_v62 = vpop.f32.mrf.mxu3 }
 0x22b   :  { %v497_v63 = vadd.f32 %v689_v61, %v496_v62 }
 0x22d   :  { %500 = vst [vmem:[#allocation11] sm:$0xff] %v497_v63 }
 0x22e   :  { %511 = dma.vmem_to_hbm [thread:$0]  %s507_s4, 128, %s509_s19, [#allocation4]  }
 0x232   :  { %v498_v0 = vpop.f32.mrf.mxu3 }
 0x233   :  { %846 = dma.done.wait [#allocation4], 128  }
 0x234   :  { %847 = vsyncadd [#allocation4], 4294967168 }
 0x235   :  { %516 = vsyncpa [#allocation3], 1 }
 0x236   :  { %517 = vsyncpa [#allocation6], 1 }
 0x237   :  { %518 = vsyncpa [#allocation9], 1 }
 0x238   :  { %519 = vsyncpa [#allocation4], 1 }

</bundles_post_ra>
